<compile_context>
chip_gen: v7x
topology: tpu7x:2x2x1
jax: 0.10.0
libtpu: 0.0.40
codegen_flags: <defaults>
</compile_context>

<pallas_src>
import functools
import math

import jax
import jax.numpy as jnp
from jax.experimental import pallas as pl
from jax.experimental.pallas import tpu as pltpu

# ----------------------- scaled-down MPNet-base config ----------------------
VOCAB = 64          # (mpnet-base: 30527)
HIDDEN = 32         # (768)
NUM_HEADS = 2       # (12)
HEAD_DIM = HIDDEN // NUM_HEADS
NUM_LAYERS = 2      # (12)
INTERMEDIATE = 64   # (3072)
NUM_BUCKETS = 32    # relative_attention_num_buckets (same as mpnet-base)
MAX_DISTANCE = 128
MAX_POS = 64        # (514)
CLS_HIDDEN = 16     # classifier hidden (512 in the torch module)
NUM_CLASSES = 2
PAD_IDX = 1
LN_EPS = 1e-12
LANE = 128          # lane-dense padding width for the classifier output slab


def _full_spec(shape):
    nd = len(shape)
    return pl.BlockSpec(shape, lambda b, _nd=nd: (0,) * _nd)


def _bf16(x):
    return x.astype(jnp.bfloat16)


# ------------------------------ in-kernel helpers -----------------------------
def _ln(x, g, b, eps=LN_EPS):
    mu = jnp.mean(x, axis=-1, keepdims=True)
    var = jnp.mean((x - mu) ** 2, axis=-1, keepdims=True)
    return (x - mu) * jax.lax.rsqrt(var + eps) * g + b


def _gelu(x):
    # TODO(synk): torch F.gelu is erf-exact; tanh approximation used here for guaranteed
    # Mosaic lowering (difference is O(1e-3) absolute on activations).
    c = math.sqrt(2.0 / math.pi)
    return 0.5 * x * (1.0 + jnp.tanh(c * (x + 0.044715 * x * x * x)))


# ------------------------------- Pallas kernels ------------------------------
def _emb_ln_kernel(x_ref, g_ref, b_ref, o_ref):
    o_ref[0] = _ln(x_ref[0], g_ref[...], b_ref[...]).astype(o_ref.dtype)


def _encoder_layer_kernel(x_ref, mask_ref, bias_ref,
                          wqkv_ref, bqkv_ref, wo_ref, bo_ref, ln1g_ref, ln1b_ref,
                          wi_ref, bi_ref, wout_ref, bout_ref, ln2g_ref, ln2b_ref,
                          o_ref, *, scale):
    x = x_ref[0]                                    # (S, H)  f32
    mask = mask_ref[0]                              # (1, S)  additive (-1e9 on pads)

    # fused Q/K/V projection: single MXU matmul, bf16 inputs, f32 accumulate
    qkv = jnp.dot(_bf16(x), _bf16(wqkv_ref[...]),
                  preferred_element_type=jnp.float32) + bqkv_ref[...]   # (S, 3H)

    # per-head attention with the output projection folded in (accumulated per head,
    # which avoids any in-kernel head reshape/transpose/concat)
    attn = jnp.zeros_like(x)
    for h in range(NUM_HEADS):
        qh = qkv[:, h * HEAD_DIM:(h + 1) * HEAD_DIM]                    # (S, D)
        kh = qkv[:, HIDDEN + h * HEAD_DIM:HIDDEN + (h + 1) * HEAD_DIM]
        vh = qkv[:, 2 * HIDDEN + h * HEAD_DIM:2 * HIDDEN + (h + 1) * HEAD_DIM]

        s = jax.lax.dot_general(_bf16(qh), _bf16(kh),
                                (((1,), (1,)), ((), ())),
                                preferred_element_type=jnp.float32)     # (S, S)
        s = s * scale + bias_ref[h] + mask

        m = jnp.max(s, axis=-1, keepdims=True)
        p = jnp.exp(s - m)
        p = p * pl.reciprocal(jnp.sum(p, axis=-1, keepdims=True), approx=True)

        ctx = jnp.dot(_bf16(p), _bf16(vh),
                      preferred_element_type=jnp.float32)               # (S, D)
        attn = attn + jnp.dot(_bf16(ctx),
                              _bf16(wo_ref[h * HEAD_DIM:(h + 1) * HEAD_DIM, :]),
                              preferred_element_type=jnp.float32)       # (S, H)
    attn = attn + bo_ref[...]

    # residual + LN1 (fused)
    h1 = _ln(attn + x, ln1g_ref[...], ln1b_ref[...])                    # (S, H)

    # FFN with fused gelu, then residual + LN2
    inter = jnp.dot(_bf16(h1), _bf16(wi_ref[...]),
                    preferred_element_type=jnp.float32) + bi_ref[...]   # (S, I)
    inter = _gelu(inter)
    out = jnp.dot(_bf16(inter), _bf16(wout_ref[...]),
                  preferred_element_type=jnp.float32) + bout_ref[...]   # (S, H)
    o_ref[0] = _ln(out + h1, ln2g_ref[...], ln2b_ref[...]).astype(o_ref.dtype)


def _classifier_kernel(x_ref, w1_ref, b1_ref, w2_ref, b2_ref, o_ref):
    cls = x_ref[0][0:1, :]                          # last_hidden_state[:, 0, :] -> (1, H)
    h = jnp.dot(_bf16(cls), _bf16(w1_ref[...]),
                preferred_element_type=jnp.float32) + b1_ref[...]
    h = jnp.maximum(h, 0.0)                         # ReLU; Dropout(0.3) identity in eval
    logits = jnp.dot(_bf16(h), _bf16(w2_ref[...]),
                     preferred_element_type=jnp.float32) + b2_ref[...]  # (1, LANE)
    o_ref[0] = logits.astype(o_ref.dtype)


# ------------------------------ kernel wrappers -------------------------------
def embeddings_layernorm(emb, gamma, beta):
    B, S, H = emb.shape
    return pl.pallas_call(
        _emb_ln_kernel,
        out_shape=jax.ShapeDtypeStruct((B, S, H), jnp.float32),
        grid=(B,),
        in_specs=[pl.BlockSpec((1, S, H), lambda b: (b, 0, 0)),
                  _full_spec((1, H)),
                  _full_spec((1, H))],
        out_specs=pl.BlockSpec((1, S, H), lambda b: (b, 0, 0)),
        compiler_params=pltpu.CompilerParams(dimension_semantics=("parallel",)),
    )(emb, gamma.reshape(1, H), beta.reshape(1, H))


def encoder_layer(x, add_mask, pos_bias, p):
    B, S, H = x.shape
    scale = 1.0 / math.sqrt(HEAD_DIM)
    return pl.pallas_call(
        functools.partial(_encoder_layer_kernel, scale=scale),
        out_shape=jax.ShapeDtypeStruct((B, S, H), jnp.float32),
        grid=(B,),
        in_specs=[
            pl.BlockSpec((1, S, H), lambda b: (b, 0, 0)),     # x
            pl.BlockSpec((1, 1, S), lambda b: (b, 0, 0)),     # additive attention mask
            _full_spec((NUM_HEADS, S, S)),                    # shared relative-pos bias
            _full_spec((H, 3 * H)), _full_spec((1, 3 * H)),   # fused QKV
            _full_spec((H, H)), _full_spec((1, H)),           # attention output proj
            _full_spec((1, H)), _full_spec((1, H)),           # LN1
            _full_spec((H, INTERMEDIATE)), _full_spec((1, INTERMEDIATE)),
            _full_spec((INTERMEDIATE, H)), _full_spec((1, H)),
            _full_spec((1, H)), _full_spec((1, H)),           # LN2
        ],
        out_specs=pl.BlockSpec((1, S, H), lambda b: (b, 0, 0)),
        compiler_params=pltpu.CompilerParams(dimension_semantics=("parallel",)),
    )(x, add_mask, pos_bias,
      p["wqkv"], p["bqkv"].reshape(1, 3 * H),
      p["wo"], p["bo"].reshape(1, H),
      p["ln1_g"].reshape(1, H), p["ln1_b"].reshape(1, H),
      p["wi"], p["bi"].reshape(1, INTERMEDIATE),
      p["wout"], p["bout"].reshape(1, H),
      p["ln2_g"].reshape(1, H), p["ln2_b"].reshape(1, H))


def classifier_head(x, p1, p2):
    B, S, H = x.shape
    # pad the final projection to a 128-lane output slab -> unmasked, lane-dense stores
    w2p = jnp.zeros((CLS_HIDDEN, LANE), jnp.float32).at[:, :NUM_CLASSES].set(p2["w"])
    b2p = jnp.zeros((1, LANE), jnp.float32).at[:, :NUM_CLASSES].set(p2["b"].reshape(1, -1))
    out = pl.pallas_call(
        _classifier_kernel,
        out_shape=jax.ShapeDtypeStruct((B, 1, LANE), jnp.float32),
        grid=(B,),
        in_specs=[pl.BlockSpec((1, S, H), lambda b: (b, 0, 0)),
                  _full_spec((H, CLS_HIDDEN)), _full_spec((1, CLS_HIDDEN)),
                  _full_spec((CLS_HIDDEN, LANE)), _full_spec((1, LANE))],
        out_specs=pl.BlockSpec((1, 1, LANE), lambda b: (b, 0, 0)),
        compiler_params=pltpu.CompilerParams(dimension_semantics=("parallel",)),
    )(x, p1["w"], p1["b"].reshape(1, CLS_HIDDEN), w2p, b2p)
    return out[:, 0, :NUM_CLASSES]


# ------------------------------- plain-JAX glue ------------------------------
def relative_position_bucket(relative_position, num_buckets=NUM_BUCKETS,
                             max_distance=MAX_DISTANCE):
    # faithful port of MPNet's relative_position_bucket
    n = -relative_position
    num_buckets //= 2
    ret = (n < 0).astype(jnp.int32) * num_buckets
    n = jnp.abs(n)
    max_exact = num_buckets // 2
    is_small = n < max_exact
    n_safe = jnp.maximum(n, 1).astype(jnp.float32)
    val_if_large = max_exact + (
        jnp.log(n_safe / max_exact) / math.log(max_distance / max_exact)
        * (num_buckets - max_exact)
    ).astype(jnp.int32)
    val_if_large = jnp.minimum(val_if_large, num_buckets - 1)
    return ret + jnp.where(is_small, n, val_if_large)


def compute_position_bias(rel_bias_table, seq_len):
    ctx = jnp.arange(seq_len)[:, None]
    mem = jnp.arange(seq_len)[None, :]
    rp_bucket = relative_position_bucket(mem - ctx)           # (S, S)
    values = rel_bias_table[rp_bucket]                        # (S, S, nH)
    return jnp.transpose(values, (2, 0, 1))                   # (nH, S, S), shared over batch


def anamnesys_forward(params, input_ids, attention_mask):
    B, S = input_ids.shape
    # MPNet embeddings: position ids computed from non-pad tokens (offset by padding_idx)
    pad_mask = (input_ids != PAD_IDX).astype(jnp.int32)
    position_ids = jnp.cumsum(pad_mask, axis=1) * pad_mask + PAD_IDX
    position_ids = jnp.minimum(position_ids, MAX_POS - 1)     # robustness clamp
    emb = params["word_emb"][input_ids] + params["pos_emb"][position_ids]
    x = embeddings_layernorm(emb, params["emb_ln_g"], params["emb_ln_b"])

    # small additive mask (B,1,S); expansion happens inside the layer kernel
    add_mask = ((1.0 - attention_mask.astype(jnp.float32)) * -1e9).reshape(B, 1, S)
    pos_bias = compute_position_bias(params["rel_bias"], S)   # (nH, S, S)

    for layer in params["layers"]:
        x = encoder_layer(x, add_mask, pos_bias, layer)

    return classifier_head(x, params["cls1"], params["cls2"])


# ------------------------------ parameter init -------------------------------
def init_params(key):
    keys = iter(jax.random.split(key, 256))

    def w(shape):
        return jax.random.normal(next(keys), shape, jnp.float32) * 0.02

    params = {
        "word_emb": w((VOCAB, HIDDEN)),
        "pos_emb": w((MAX_POS, HIDDEN)),
        "emb_ln_g": jnp.ones((HIDDEN,), jnp.float32),
        "emb_ln_b": jnp.zeros((HIDDEN,), jnp.float32),
        "rel_bias": w((NUM_BUCKETS, NUM_HEADS)),
        "layers": [],
        "cls1": {"w": w((HIDDEN, CLS_HIDDEN)), "b": jnp.zeros((CLS_HIDDEN,), jnp.float32)},
        "cls2": {"w": w((CLS_HIDDEN, NUM_CLASSES)), "b": jnp.zeros((NUM_CLASSES,), jnp.float32)},
    }
    for _ in range(NUM_LAYERS):
        params["layers"].append({
            "wqkv": w((HIDDEN, 3 * HIDDEN)),            # Q|K|V concatenated
            "bqkv": jnp.zeros((3 * HIDDEN,), jnp.float32),
            "wo": w((HIDDEN, HIDDEN)),
            "bo": jnp.zeros((HIDDEN,), jnp.float32),
            "ln1_g": jnp.ones((HIDDEN,), jnp.float32),
            "ln1_b": jnp.zeros((HIDDEN,), jnp.float32),
            "wi": w((HIDDEN, INTERMEDIATE)),
            "bi": jnp.zeros((INTERMEDIATE,), jnp.float32),
            "wout": w((INTERMEDIATE, HIDDEN)),
            "bout": jnp.zeros((HIDDEN,), jnp.float32),
            "ln2_g": jnp.ones((HIDDEN,), jnp.float32),
            "ln2_b": jnp.zeros((HIDDEN,), jnp.float32),
        })
    return params


# ------------------------------------ main ------------------------------------
if __name__ == "__main__":
    key = jax.random.PRNGKey(0)
    pkey, ikey = jax.random.split(key)
    params = init_params(pkey)

    B, S = 2, 8
    input_ids = jax.random.randint(ikey, (B, S), 2, VOCAB, dtype=jnp.int32)
    input_ids = input_ids.at[:, 0].set(0)                 # <s> (CLS) token id
    attention_mask = jnp.ones((B, S), jnp.int32)
    input_ids = input_ids.at[1, S - 2:].set(PAD_IDX)      # pad tail of example 1
    attention_mask = attention_mask.at[1, S - 2:].set(0)

    fwd = jax.jit(anamnesys_forward)
    logits = fwd(params, input_ids, attention_mask)
    jax.block_until_ready(logits)

    assert logits.shape == (B, NUM_CLASSES), logits.shape
    assert bool(jnp.all(jnp.isfinite(logits)))
    print("KERNEL_OK")
</pallas_src>

<mosaic_0001>
module attributes {stable_mosaic.version = 11 : i64} {
  func.func @_encoder_layer_kernel(%arg0: i32, %arg1: memref<1x8x32xf32, #tpu.memory_space<vmem>>, %arg2: memref<1x1x8xf32, #tpu.memory_space<vmem>>, %arg3: memref<2x8x8xf32, #tpu.memory_space<vmem>>, %arg4: memref<32x96xf32, #tpu.memory_space<vmem>>, %arg5: memref<1x96xf32, #tpu.memory_space<vmem>>, %arg6: memref<32x32xf32, #tpu.memory_space<vmem>>, %arg7: memref<1x32xf32, #tpu.memory_space<vmem>>, %arg8: memref<1x32xf32, #tpu.memory_space<vmem>>, %arg9: memref<1x32xf32, #tpu.memory_space<vmem>>, %arg10: memref<32x64xf32, #tpu.memory_space<vmem>>, %arg11: memref<1x64xf32, #tpu.memory_space<vmem>>, %arg12: memref<64x32xf32, #tpu.memory_space<vmem>>, %arg13: memref<1x32xf32, #tpu.memory_space<vmem>>, %arg14: memref<1x32xf32, #tpu.memory_space<vmem>>, %arg15: memref<1x32xf32, #tpu.memory_space<vmem>>, %arg16: memref<1x8x32xf32, #tpu.memory_space<vmem>>) attributes {dimension_semantics = [#tpu.dimension_semantics<parallel>], iteration_bounds = array<i64: 2>, scalar_prefetch = 0 : i64, scratch_operands = 0 : i64, tpu.core_type = #tpu.core_type<tc>, window_params = [{transform_indices = @transform_0, window_bounds = array<i64: 1, 8, 32>}, {transform_indices = @transform_1, window_bounds = array<i64: 1, 1, 8>}, {pipeline_mode = #tpu.pipeline_mode<synchronous>, transform_indices = @transform_2, window_bounds = array<i64: 2, 8, 8>}, {pipeline_mode = #tpu.pipeline_mode<synchronous>, transform_indices = @transform_3, window_bounds = array<i64: 32, 96>}, {pipeline_mode = #tpu.pipeline_mode<synchronous>, transform_indices = @transform_4, window_bounds = array<i64: 1, 96>}, {pipeline_mode = #tpu.pipeline_mode<synchronous>, transform_indices = @transform_5, window_bounds = array<i64: 32, 32>}, {pipeline_mode = #tpu.pipeline_mode<synchronous>, transform_indices = @transform_6, window_bounds = array<i64: 1, 32>}, {pipeline_mode = #tpu.pipeline_mode<synchronous>, transform_indices = @transform_7, window_bounds = array<i64: 1, 32>}, {pipeline_mode = #tpu.pipeline_mode<synchronous>, transform_indices = @transform_8, window_bounds = array<i64: 1, 32>}, {pipeline_mode = #tpu.pipeline_mode<synchronous>, transform_indices = @transform_9, window_bounds = array<i64: 32, 64>}, {pipeline_mode = #tpu.pipeline_mode<synchronous>, transform_indices = @transform_10, window_bounds = array<i64: 1, 64>}, {pipeline_mode = #tpu.pipeline_mode<synchronous>, transform_indices = @transform_11, window_bounds = array<i64: 64, 32>}, {pipeline_mode = #tpu.pipeline_mode<synchronous>, transform_indices = @transform_12, window_bounds = array<i64: 1, 32>}, {pipeline_mode = #tpu.pipeline_mode<synchronous>, transform_indices = @transform_13, window_bounds = array<i64: 1, 32>}, {pipeline_mode = #tpu.pipeline_mode<synchronous>, transform_indices = @transform_14, window_bounds = array<i64: 1, 32>}, {transform_indices = @transform_15, window_bounds = array<i64: 1, 8, 32>}]} {
    %c0 = arith.constant 0 : index
    %c0_0 = arith.constant 0 : index
    %c0_1 = arith.constant 0 : index
    %0 = vector.load %arg1[%c0, %c0_0, %c0_1] : memref<1x8x32xf32, #tpu.memory_space<vmem>>, vector<1x8x32xf32>
    %1 = vector.shape_cast %0 : vector<1x8x32xf32> to vector<8x32xf32>
    %c0_2 = arith.constant 0 : index
    %c0_3 = arith.constant 0 : index
    %c0_4 = arith.constant 0 : index
    %2 = vector.load %arg2[%c0_2, %c0_3, %c0_4] : memref<1x1x8xf32, #tpu.memory_space<vmem>>, vector<1x1x8xf32>
    %3 = vector.shape_cast %2 : vector<1x1x8xf32> to vector<1x8xf32>
    %4 = arith.truncf %1 : vector<8x32xf32> to vector<8x32xbf16>
    %c0_5 = arith.constant 0 : index
    %c0_6 = arith.constant 0 : index
    %5 = vector.load %arg4[%c0_5, %c0_6] : memref<32x96xf32, #tpu.memory_space<vmem>>, vector<32x96xf32>
    %6 = arith.truncf %5 : vector<32x96xf32> to vector<32x96xbf16>
    %cst = arith.constant dense<0.000000e+00> : vector<8x96xf32>
    %7 = tpu.matmul %4, %6, %cst {dimension_numbers = #tpu.dot_dimension_numbers<[1], [0], [0], [1], [0, 0, 1, 1], [], []>} : vector<8x32xbf16>, vector<32x96xbf16>, vector<8x96xf32> -> vector<8x96xf32>
    %c0_7 = arith.constant 0 : index
    %c0_8 = arith.constant 0 : index
    %8 = vector.load %arg5[%c0_7, %c0_8] : memref<1x96xf32, #tpu.memory_space<vmem>>, vector<1x96xf32>
    %9 = vector.broadcast %8 : vector<1x96xf32> to vector<8x96xf32>
    %10 = arith.addf %7, %9 : vector<8x96xf32>
    %cst_9 = arith.constant 0.000000e+00 : f32
    %11 = vector.broadcast %cst_9 : f32 to vector<8x32xf32>
    %12 = vector.extract_strided_slice %10 {offsets = [0, 0], sizes = [8, 16], strides = [1, 1]} : vector<8x96xf32> to vector<8x16xf32>
    %13 = vector.extract_strided_slice %10 {offsets = [0, 32], sizes = [8, 16], strides = [1, 1]} : vector<8x96xf32> to vector<8x16xf32>
    %14 = vector.extract_strided_slice %10 {offsets = [0, 64], sizes = [8, 16], strides = [1, 1]} : vector<8x96xf32> to vector<8x16xf32>
    %15 = arith.truncf %12 : vector<8x16xf32> to vector<8x16xbf16>
    %16 = arith.truncf %13 : vector<8x16xf32> to vector<8x16xbf16>
    %cst_10 = arith.constant dense<0.000000e+00> : vector<8x8xf32>
    %17 = tpu.matmul %15, %16, %cst_10 {dimension_numbers = #tpu.dot_dimension_numbers<[1], [1], [0], [0], [0, 0, 1, 0], [], []>} : vector<8x16xbf16>, vector<8x16xbf16>, vector<8x8xf32> -> vector<8x8xf32>
    %cst_11 = arith.constant 2.500000e-01 : f32
    %18 = vector.broadcast %cst_11 : f32 to vector<8x8xf32>
    %19 = arith.mulf %17, %18 : vector<8x8xf32>
    %c0_12 = arith.constant 0 : index
    %c0_13 = arith.constant 0 : index
    %c0_14 = arith.constant 0 : index
    %20 = vector.load %arg3[%c0_12, %c0_13, %c0_14] : memref<2x8x8xf32, #tpu.memory_space<vmem>>, vector<1x8x8xf32>
    %21 = vector.shape_cast %20 : vector<1x8x8xf32> to vector<8x8xf32>
    %22 = arith.addf %19, %21 : vector<8x8xf32>
    %23 = vector.broadcast %3 : vector<1x8xf32> to vector<8x8xf32>
    %24 = arith.addf %22, %23 : vector<8x8xf32>
    %cst_15 = arith.constant dense<0xFF800000> : vector<8xf32>
    %25 = vector.multi_reduction <maximumf>, %24, %cst_15 [1] : vector<8x8xf32> to vector<8xf32>
    %26 = vector.shape_cast %25 : vector<8xf32> to vector<8x1xf32>
    %27 = vector.broadcast %26 : vector<8x1xf32> to vector<8x8xf32>
    %28 = arith.subf %24, %27 : vector<8x8xf32>
    %29 = math.exp %28 : vector<8x8xf32>
    %cst_16 = arith.constant dense<0.000000e+00> : vector<8xf32>
    %30 = vector.multi_reduction <add>, %29, %cst_16 [1] : vector<8x8xf32> to vector<8xf32>
    %31 = vector.shape_cast %30 : vector<8xf32> to vector<8x1xf32>
    %32 = tpu.reciprocal %31 {approx = true} : vector<8x1xf32> -> vector<8x1xf32>
    %33 = vector.broadcast %32 : vector<8x1xf32> to vector<8x8xf32>
    %34 = arith.mulf %29, %33 : vector<8x8xf32>
    %35 = arith.truncf %34 : vector<8x8xf32> to vector<8x8xbf16>
    %36 = arith.truncf %14 : vector<8x16xf32> to vector<8x16xbf16>
    %cst_17 = arith.constant dense<0.000000e+00> : vector<8x16xf32>
    %37 = tpu.matmul %35, %36, %cst_17 {dimension_numbers = #tpu.dot_dimension_numbers<[1], [0], [0], [1], [0, 0, 1, 1], [], []>} : vector<8x8xbf16>, vector<8x16xbf16>, vector<8x16xf32> -> vector<8x16xf32>
    %38 = arith.truncf %37 : vector<8x16xf32> to vector<8x16xbf16>
    %c0_18 = arith.constant 0 : index
    %c0_19 = arith.constant 0 : index
    %39 = vector.load %arg6[%c0_18, %c0_19] : memref<32x32xf32, #tpu.memory_space<vmem>>, vector<16x32xf32>
    %40 = arith.truncf %39 : vector<16x32xf32> to vector<16x32xbf16>
    %cst_20 = arith.constant dense<0.000000e+00> : vector<8x32xf32>
    %41 = tpu.matmul %38, %40, %cst_20 {dimension_numbers = #tpu.dot_dimension_numbers<[1], [0], [0], [1], [0, 0, 1, 1], [], []>} : vector<8x16xbf16>, vector<16x32xbf16>, vector<8x32xf32> -> vector<8x32xf32>
    %42 = arith.addf %11, %41 : vector<8x32xf32>
    %43 = vector.extract_strided_slice %10 {offsets = [0, 16], sizes = [8, 16], strides = [1, 1]} : vector<8x96xf32> to vector<8x16xf32>
    %44 = vector.extract_strided_slice %10 {offsets = [0, 48], sizes = [8, 16], strides = [1, 1]} : vector<8x96xf32> to vector<8x16xf32>
    %45 = vector.extract_strided_slice %10 {offsets = [0, 80], sizes = [8, 16], strides = [1, 1]} : vector<8x96xf32> to vector<8x16xf32>
    %46 = arith.truncf %43 : vector<8x16xf32> to vector<8x16xbf16>
    %47 = arith.truncf %44 : vector<8x16xf32> to vector<8x16xbf16>
    %cst_21 = arith.constant dense<0.000000e+00> : vector<8x8xf32>
    %48 = tpu.matmul %46, %47, %cst_21 {dimension_numbers = #tpu.dot_dimension_numbers<[1], [1], [0], [0], [0, 0, 1, 0], [], []>} : vector<8x16xbf16>, vector<8x16xbf16>, vector<8x8xf32> -> vector<8x8xf32>
    %cst_22 = arith.constant 2.500000e-01 : f32
    %49 = vector.broadcast %cst_22 : f32 to vector<8x8xf32>
    %50 = arith.mulf %48, %49 : vector<8x8xf32>
    %c1 = arith.constant 1 : index
    %c0_23 = arith.constant 0 : index
    %c0_24 = arith.constant 0 : index
    %51 = vector.load %arg3[%c1, %c0_23, %c0_24] : memref<2x8x8xf32, #tpu.memory_space<vmem>>, vector<1x8x8xf32>
    %52 = vector.shape_cast %51 : vector<1x8x8xf32> to vector<8x8xf32>
    %53 = arith.addf %50, %52 : vector<8x8xf32>
    %54 = vector.broadcast %3 : vector<1x8xf32> to vector<8x8xf32>
    %55 = arith.addf %53, %54 : vector<8x8xf32>
    %cst_25 = arith.constant dense<0xFF800000> : vector<8xf32>
    %56 = vector.multi_reduction <maximumf>, %55, %cst_25 [1] : vector<8x8xf32> to vector<8xf32>
    %57 = vector.shape_cast %56 : vector<8xf32> to vector<8x1xf32>
    %58 = vector.broadcast %57 : vector<8x1xf32> to vector<8x8xf32>
    %59 = arith.subf %55, %58 : vector<8x8xf32>
    %60 = math.exp %59 : vector<8x8xf32>
    %cst_26 = arith.constant dense<0.000000e+00> : vector<8xf32>
    %61 = vector.multi_reduction <add>, %60, %cst_26 [1] : vector<8x8xf32> to vector<8xf32>
    %62 = vector.shape_cast %61 : vector<8xf32> to vector<8x1xf32>
    %63 = tpu.reciprocal %62 {approx = true} : vector<8x1xf32> -> vector<8x1xf32>
    %64 = vector.broadcast %63 : vector<8x1xf32> to vector<8x8xf32>
    %65 = arith.mulf %60, %64 : vector<8x8xf32>
    %66 = arith.truncf %65 : vector<8x8xf32> to vector<8x8xbf16>
    %67 = arith.truncf %45 : vector<8x16xf32> to vector<8x16xbf16>
    %cst_27 = arith.constant dense<0.000000e+00> : vector<8x16xf32>
    %68 = tpu.matmul %66, %67, %cst_27 {dimension_numbers = #tpu.dot_dimension_numbers<[1], [0], [0], [1], [0, 0, 1, 1], [], []>} : vector<8x8xbf16>, vector<8x16xbf16>, vector<8x16xf32> -> vector<8x16xf32>
    %69 = arith.truncf %68 : vector<8x16xf32> to vector<8x16xbf16>
    %c16 = arith.constant 16 : index
    %c0_28 = arith.constant 0 : index
    %70 = vector.load %arg6[%c16, %c0_28] : memref<32x32xf32, #tpu.memory_space<vmem>>, vector<16x32xf32>
    %71 = arith.truncf %70 : vector<16x32xf32> to vector<16x32xbf16>
    %cst_29 = arith.constant dense<0.000000e+00> : vector<8x32xf32>
    %72 = tpu.matmul %69, %71, %cst_29 {dimension_numbers = #tpu.dot_dimension_numbers<[1], [0], [0], [1], [0, 0, 1, 1], [], []>} : vector<8x16xbf16>, vector<16x32xbf16>, vector<8x32xf32> -> vector<8x32xf32>
    %73 = arith.addf %42, %72 : vector<8x32xf32>
    %c0_30 = arith.constant 0 : index
    %c0_31 = arith.constant 0 : index
    %74 = vector.load %arg7[%c0_30, %c0_31] : memref<1x32xf32, #tpu.memory_space<vmem>>, vector<1x32xf32>
    %75 = vector.broadcast %74 : vector<1x32xf32> to vector<8x32xf32>
    %76 = arith.addf %73, %75 : vector<8x32xf32>
    %77 = arith.addf %76, %1 : vector<8x32xf32>
    %c0_32 = arith.constant 0 : index
    %c0_33 = arith.constant 0 : index
    %78 = vector.load %arg8[%c0_32, %c0_33] : memref<1x32xf32, #tpu.memory_space<vmem>>, vector<1x32xf32>
    %c0_34 = arith.constant 0 : index
    %c0_35 = arith.constant 0 : index
    %79 = vector.load %arg9[%c0_34, %c0_35] : memref<1x32xf32, #tpu.memory_space<vmem>>, vector<1x32xf32>
    %cst_36 = arith.constant dense<0.000000e+00> : vector<8xf32>
    %80 = vector.multi_reduction <add>, %77, %cst_36 [1] : vector<8x32xf32> to vector<8xf32>
    %81 = vector.shape_cast %80 : vector<8xf32> to vector<8x1xf32>
    %cst_37 = arith.constant 3.200000e+01 : f32
    %82 = vector.broadcast %cst_37 : f32 to vector<8x1xf32>
    %83 = arith.divf %81, %82 : vector<8x1xf32>
    %84 = vector.broadcast %83 : vector<8x1xf32> to vector<8x32xf32>
    %85 = arith.subf %77, %84 : vector<8x32xf32>
    %86 = arith.mulf %85, %85 : vector<8x32xf32>
    %cst_38 = arith.constant dense<0.000000e+00> : vector<8xf32>
    %87 = vector.multi_reduction <add>, %86, %cst_38 [1] : vector<8x32xf32> to vector<8xf32>
    %88 = vector.shape_cast %87 : vector<8xf32> to vector<8x1xf32>
    %cst_39 = arith.constant 3.200000e+01 : f32
    %89 = vector.broadcast %cst_39 : f32 to vector<8x1xf32>
    %90 = arith.divf %88, %89 : vector<8x1xf32>
    %91 = vector.broadcast %83 : vector<8x1xf32> to vector<8x32xf32>
    %92 = arith.subf %77, %91 : vector<8x32xf32>
    %cst_40 = arith.constant 9.99999996E-13 : f32
    %93 = vector.broadcast %cst_40 : f32 to vector<8x1xf32>
    %94 = arith.addf %90, %93 : vector<8x1xf32>
    %95 = math.rsqrt %94 : vector<8x1xf32>
    %96 = vector.broadcast %95 : vector<8x1xf32> to vector<8x32xf32>
    %97 = arith.mulf %92, %96 : vector<8x32xf32>
    %98 = vector.broadcast %78 : vector<1x32xf32> to vector<8x32xf32>
    %99 = arith.mulf %97, %98 : vector<8x32xf32>
    %100 = vector.broadcast %79 : vector<1x32xf32> to vector<8x32xf32>
    %101 = arith.addf %99, %100 : vector<8x32xf32>
    %102 = arith.truncf %101 : vector<8x32xf32> to vector<8x32xbf16>
    %c0_41 = arith.constant 0 : index
    %c0_42 = arith.constant 0 : index
    %103 = vector.load %arg10[%c0_41, %c0_42] : memref<32x64xf32, #tpu.memory_space<vmem>>, vector<32x64xf32>
    %104 = arith.truncf %103 : vector<32x64xf32> to vector<32x64xbf16>
    %cst_43 = arith.constant dense<0.000000e+00> : vector<8x64xf32>
    %105 = tpu.matmul %102, %104, %cst_43 {dimension_numbers = #tpu.dot_dimension_numbers<[1], [0], [0], [1], [0, 0, 1, 1], [], []>} : vector<8x32xbf16>, vector<32x64xbf16>, vector<8x64xf32> -> vector<8x64xf32>
    %c0_44 = arith.constant 0 : index
    %c0_45 = arith.constant 0 : index
    %106 = vector.load %arg11[%c0_44, %c0_45] : memref<1x64xf32, #tpu.memory_space<vmem>>, vector<1x64xf32>
    %107 = vector.broadcast %106 : vector<1x64xf32> to vector<8x64xf32>
    %108 = arith.addf %105, %107 : vector<8x64xf32>
    %cst_46 = arith.constant 5.000000e-01 : f32
    %109 = vector.broadcast %cst_46 : f32 to vector<8x64xf32>
    %110 = arith.mulf %109, %108 : vector<8x64xf32>
    %cst_47 = arith.constant 4.471500e-02 : f32
    %111 = vector.broadcast %cst_47 : f32 to vector<8x64xf32>
    %112 = arith.mulf %111, %108 : vector<8x64xf32>
    %113 = arith.mulf %112, %108 : vector<8x64xf32>
    %114 = arith.mulf %113, %108 : vector<8x64xf32>
    %115 = arith.addf %108, %114 : vector<8x64xf32>
    %cst_48 = arith.constant 0.797884583 : f32
    %116 = vector.broadcast %cst_48 : f32 to vector<8x64xf32>
    %117 = arith.mulf %116, %115 : vector<8x64xf32>
    %118 = math.tanh %117 : vector<8x64xf32>
    %cst_49 = arith.constant 1.000000e+00 : f32
    %119 = vector.broadcast %cst_49 : f32 to vector<8x64xf32>
    %120 = arith.addf %119, %118 : vector<8x64xf32>
    %121 = arith.mulf %110, %120 : vector<8x64xf32>
    %122 = arith.truncf %121 : vector<8x64xf32> to vector<8x64xbf16>
    %c0_50 = arith.constant 0 : index
    %c0_51 = arith.constant 0 : index
    %123 = vector.load %arg12[%c0_50, %c0_51] : memref<64x32xf32, #tpu.memory_space<vmem>>, vector<64x32xf32>
    %124 = arith.truncf %123 : vector<64x32xf32> to vector<64x32xbf16>
    %cst_52 = arith.constant dense<0.000000e+00> : vector<8x32xf32>
    %125 = tpu.matmul %122, %124, %cst_52 {dimension_numbers = #tpu.dot_dimension_numbers<[1], [0], [0], [1], [0, 0, 1, 1], [], []>} : vector<8x64xbf16>, vector<64x32xbf16>, vector<8x32xf32> -> vector<8x32xf32>
    %c0_53 = arith.constant 0 : index
    %c0_54 = arith.constant 0 : index
    %126 = vector.load %arg13[%c0_53, %c0_54] : memref<1x32xf32, #tpu.memory_space<vmem>>, vector<1x32xf32>
    %127 = vector.broadcast %126 : vector<1x32xf32> to vector<8x32xf32>
    %128 = arith.addf %125, %127 : vector<8x32xf32>
    %129 = arith.addf %128, %101 : vector<8x32xf32>
    %c0_55 = arith.constant 0 : index
    %c0_56 = arith.constant 0 : index
    %130 = vector.load %arg14[%c0_55, %c0_56] : memref<1x32xf32, #tpu.memory_space<vmem>>, vector<1x32xf32>
    %c0_57 = arith.constant 0 : index
    %c0_58 = arith.constant 0 : index
    %131 = vector.load %arg15[%c0_57, %c0_58] : memref<1x32xf32, #tpu.memory_space<vmem>>, vector<1x32xf32>
    %cst_59 = arith.constant dense<0.000000e+00> : vector<8xf32>
    %132 = vector.multi_reduction <add>, %129, %cst_59 [1] : vector<8x32xf32> to vector<8xf32>
    %133 = vector.shape_cast %132 : vector<8xf32> to vector<8x1xf32>
    %cst_60 = arith.constant 3.200000e+01 : f32
    %134 = vector.broadcast %cst_60 : f32 to vector<8x1xf32>
    %135 = arith.divf %133, %134 : vector<8x1xf32>
    %136 = vector.broadcast %135 : vector<8x1xf32> to vector<8x32xf32>
    %137 = arith.subf %129, %136 : vector<8x32xf32>
    %138 = arith.mulf %137, %137 : vector<8x32xf32>
    %cst_61 = arith.constant dense<0.000000e+00> : vector<8xf32>
    %139 = vector.multi_reduction <add>, %138, %cst_61 [1] : vector<8x32xf32> to vector<8xf32>
    %140 = vector.shape_cast %139 : vector<8xf32> to vector<8x1xf32>
    %cst_62 = arith.constant 3.200000e+01 : f32
    %141 = vector.broadcast %cst_62 : f32 to vector<8x1xf32>
    %142 = arith.divf %140, %141 : vector<8x1xf32>
    %143 = vector.broadcast %135 : vector<8x1xf32> to vector<8x32xf32>
    %144 = arith.subf %129, %143 : vector<8x32xf32>
    %cst_63 = arith.constant 9.99999996E-13 : f32
    %145 = vector.broadcast %cst_63 : f32 to vector<8x1xf32>
    %146 = arith.addf %142, %145 : vector<8x1xf32>
    %147 = math.rsqrt %146 : vector<8x1xf32>
    %148 = vector.broadcast %147 : vector<8x1xf32> to vector<8x32xf32>
    %149 = arith.mulf %144, %148 : vector<8x32xf32>
    %150 = vector.broadcast %130 : vector<1x32xf32> to vector<8x32xf32>
    %151 = arith.mulf %149, %150 : vector<8x32xf32>
    %152 = vector.broadcast %131 : vector<1x32xf32> to vector<8x32xf32>
    %153 = arith.addf %151, %152 : vector<8x32xf32>
    %c0_64 = arith.constant 0 : index
    %c0_65 = arith.constant 0 : index
    %c0_66 = arith.constant 0 : index
    %154 = vector.load %arg16[%c0_64, %c0_65, %c0_66] : memref<1x8x32xf32, #tpu.memory_space<vmem>>, vector<1x8x32xf32>
    %155 = vector.shape_cast %154 : vector<1x8x32xf32> to vector<8x32xf32>
    %156 = vector.shape_cast %153 : vector<8x32xf32> to vector<1x8x32xf32>
    tpu.vector_store %arg16[%c0_64, %c0_65, %c0_66], %156 {strides = array<i32>} : memref<1x8x32xf32, #tpu.memory_space<vmem>>, vector<1x8x32xf32>,
    return
  }
  func.func @transform_0(%arg0: i32) -> (i32, i32, i32) {
    %c0_i32 = arith.constant 0 : i32
    %c0_i32_0 = arith.constant 0 : i32
    %c0_i32_1 = arith.constant 0 : i32
    return %arg0, %c0_i32, %c0_i32_0 : i32, i32, i32
  }
  func.func @transform_1(%arg0: i32) -> (i32, i32, i32) {
    %c0_i32 = arith.constant 0 : i32
    %c0_i32_0 = arith.constant 0 : i32
    %c0_i32_1 = arith.constant 0 : i32
    return %arg0, %c0_i32, %c0_i32_0 : i32, i32, i32
  }
  func.func @transform_2(%arg0: i32) -> (i32, i32, i32) {
    %c0_i32 = arith.constant 0 : i32
    %c0_i32_0 = arith.constant 0 : i32
    %c0_i32_1 = arith.constant 0 : i32
    %c0_i32_2 = arith.constant 0 : i32
    return %c0_i32, %c0_i32_0, %c0_i32_1 : i32, i32, i32
  }
  func.func @transform_3(%arg0: i32) -> (i32, i32) {
    %c0_i32 = arith.constant 0 : i32
    %c0_i32_0 = arith.constant 0 : i32
    %c0_i32_1 = arith.constant 0 : i32
    return %c0_i32, %c0_i32_0 : i32, i32
  }
  func.func @transform_4(%arg0: i32) -> (i32, i32) {
    %c0_i32 = arith.constant 0 : i32
    %c0_i32_0 = arith.constant 0 : i32
    %c0_i32_1 = arith.constant 0 : i32
    return %c0_i32, %c0_i32_0 : i32, i32
  }
  func.func @transform_5(%arg0: i32) -> (i32, i32) {
    %c0_i32 = arith.constant 0 : i32
    %c0_i32_0 = arith.constant 0 : i32
    %c0_i32_1 = arith.constant 0 : i32
    return %c0_i32, %c0_i32_0 : i32, i32
  }
  func.func @transform_6(%arg0: i32) -> (i32, i32) {
    %c0_i32 = arith.constant 0 : i32
    %c0_i32_0 = arith.constant 0 : i32
    %c0_i32_1 = arith.constant 0 : i32
    return %c0_i32, %c0_i32_0 : i32, i32
  }
  func.func @transform_7(%arg0: i32) -> (i32, i32) {
    %c0_i32 = arith.constant 0 : i32
    %c0_i32_0 = arith.constant 0 : i32
    %c0_i32_1 = arith.constant 0 : i32
    return %c0_i32, %c0_i32_0 : i32, i32
  }
  func.func @transform_8(%arg0: i32) -> (i32, i32) {
    %c0_i32 = arith.constant 0 : i32
    %c0_i32_0 = arith.constant 0 : i32
    %c0_i32_1 = arith.constant 0 : i32
    return %c0_i32, %c0_i32_0 : i32, i32
  }
  func.func @transform_9(%arg0: i32) -> (i32, i32) {
    %c0_i32 = arith.constant 0 : i32
    %c0_i32_0 = arith.constant 0 : i32
    %c0_i32_1 = arith.constant 0 : i32
    return %c0_i32, %c0_i32_0 : i32, i32
  }
  func.func @transform_10(%arg0: i32) -> (i32, i32) {
    %c0_i32 = arith.constant 0 : i32
    %c0_i32_0 = arith.constant 0 : i32
    %c0_i32_1 = arith.constant 0 : i32
    return %c0_i32, %c0_i32_0 : i32, i32
  }
  func.func @transform_11(%arg0: i32) -> (i32, i32) {
    %c0_i32 = arith.constant 0 : i32
    %c0_i32_0 = arith.constant 0 : i32
    %c0_i32_1 = arith.constant 0 : i32
    return %c0_i32, %c0_i32_0 : i32, i32
  }
  func.func @transform_12(%arg0: i32) -> (i32, i32) {
    %c0_i32 = arith.constant 0 : i32
    %c0_i32_0 = arith.constant 0 : i32
    %c0_i32_1 = arith.constant 0 : i32
    return %c0_i32, %c0_i32_0 : i32, i32
  }
  func.func @transform_13(%arg0: i32) -> (i32, i32) {
    %c0_i32 = arith.constant 0 : i32
    %c0_i32_0 = arith.constant 0 : i32
    %c0_i32_1 = arith.constant 0 : i32
    return %c0_i32, %c0_i32_0 : i32, i32
  }
  func.func @transform_14(%arg0: i32) -> (i32, i32) {
    %c0_i32 = arith.constant 0 : i32
    %c0_i32_0 = arith.constant 0 : i32
    %c0_i32_1 = arith.constant 0 : i32
    return %c0_i32, %c0_i32_0 : i32, i32
  }
  func.func @transform_15(%arg0: i32) -> (i32, i32, i32) {
    %c0_i32 = arith.constant 0 : i32
    %c0_i32_0 = arith.constant 0 : i32
    %c0_i32_1 = arith.constant 0 : i32
    return %arg0, %c0_i32, %c0_i32_0 : i32, i32, i32
  }
}

module attributes {stable_mosaic.version = 11 : i64} {
  func.func @_emb_ln_kernel(%arg0: i32, %arg1: memref<1x8x32xf32, #tpu.memory_space<vmem>>, %arg2: memref<1x32xf32, #tpu.memory_space<vmem>>, %arg3: memref<1x32xf32, #tpu.memory_space<vmem>>, %arg4: memref<1x8x32xf32, #tpu.memory_space<vmem>>) attributes {dimension_semantics = [#tpu.dimension_semantics<parallel>], iteration_bounds = array<i64: 2>, scalar_prefetch = 0 : i64, scratch_operands = 0 : i64, tpu.core_type = #tpu.core_type<tc>, window_params = [{transform_indices = @transform_0, window_bounds = array<i64: 1, 8, 32>}, {pipeline_mode = #tpu.pipeline_mode<synchronous>, transform_indices = @transform_1, window_bounds = array<i64: 1, 32>}, {pipeline_mode = #tpu.pipeline_mode<synchronous>, transform_indices = @transform_2, window_bounds = array<i64: 1, 32>}, {transform_indices = @transform_3, window_bounds = array<i64: 1, 8, 32>}]} {
    %c0 = arith.constant 0 : index
    %c0_0 = arith.constant 0 : index
    %c0_1 = arith.constant 0 : index
    %0 = vector.load %arg1[%c0, %c0_0, %c0_1] : memref<1x8x32xf32, #tpu.memory_space<vmem>>, vector<1x8x32xf32>
    %1 = vector.shape_cast %0 : vector<1x8x32xf32> to vector<8x32xf32>
    %c0_2 = arith.constant 0 : index
    %c0_3 = arith.constant 0 : index
    %2 = vector.load %arg2[%c0_2, %c0_3] : memref<1x32xf32, #tpu.memory_space<vmem>>, vector<1x32xf32>
    %c0_4 = arith.constant 0 : index
    %c0_5 = arith.constant 0 : index
    %3 = vector.load %arg3[%c0_4, %c0_5] : memref<1x32xf32, #tpu.memory_space<vmem>>, vector<1x32xf32>
    %cst = arith.constant dense<0.000000e+00> : vector<8xf32>
    %4 = vector.multi_reduction <add>, %1, %cst [1] : vector<8x32xf32> to vector<8xf32>
    %5 = vector.shape_cast %4 : vector<8xf32> to vector<8x1xf32>
    %cst_6 = arith.constant 3.200000e+01 : f32
    %6 = vector.broadcast %cst_6 : f32 to vector<8x1xf32>
    %7 = arith.divf %5, %6 : vector<8x1xf32>
    %8 = vector.broadcast %7 : vector<8x1xf32> to vector<8x32xf32>
    %9 = arith.subf %1, %8 : vector<8x32xf32>
    %10 = arith.mulf %9, %9 : vector<8x32xf32>
    %cst_7 = arith.constant dense<0.000000e+00> : vector<8xf32>
    %11 = vector.multi_reduction <add>, %10, %cst_7 [1] : vector<8x32xf32> to vector<8xf32>
    %12 = vector.shape_cast %11 : vector<8xf32> to vector<8x1xf32>
    %cst_8 = arith.constant 3.200000e+01 : f32
    %13 = vector.broadcast %cst_8 : f32 to vector<8x1xf32>
    %14 = arith.divf %12, %13 : vector<8x1xf32>
    %15 = vector.broadcast %7 : vector<8x1xf32> to vector<8x32xf32>
    %16 = arith.subf %1, %15 : vector<8x32xf32>
    %cst_9 = arith.constant 9.99999996E-13 : f32
    %17 = vector.broadcast %cst_9 : f32 to vector<8x1xf32>
    %18 = arith.addf %14, %17 : vector<8x1xf32>
    %19 = math.rsqrt %18 : vector<8x1xf32>
    %20 = vector.broadcast %19 : vector<8x1xf32> to vector<8x32xf32>
    %21 = arith.mulf %16, %20 : vector<8x32xf32>
    %22 = vector.broadcast %2 : vector<1x32xf32> to vector<8x32xf32>
    %23 = arith.mulf %21, %22 : vector<8x32xf32>
    %24 = vector.broadcast %3 : vector<1x32xf32> to vector<8x32xf32>
    %25 = arith.addf %23, %24 : vector<8x32xf32>
    %c0_10 = arith.constant 0 : index
    %c0_11 = arith.constant 0 : index
    %c0_12 = arith.constant 0 : index
    %26 = vector.load %arg4[%c0_10, %c0_11, %c0_12] : memref<1x8x32xf32, #tpu.memory_space<vmem>>, vector<1x8x32xf32>
    %27 = vector.shape_cast %26 : vector<1x8x32xf32> to vector<8x32xf32>
    %28 = vector.shape_cast %25 : vector<8x32xf32> to vector<1x8x32xf32>
    tpu.vector_store %arg4[%c0_10, %c0_11, %c0_12], %28 {strides = array<i32>} : memref<1x8x32xf32, #tpu.memory_space<vmem>>, vector<1x8x32xf32>,
    return
  }
  func.func @transform_0(%arg0: i32) -> (i32, i32, i32) {
    %c0_i32 = arith.constant 0 : i32
    %c0_i32_0 = arith.constant 0 : i32
    %c0_i32_1 = arith.constant 0 : i32
    return %arg0, %c0_i32, %c0_i32_0 : i32, i32, i32
  }
  func.func @transform_1(%arg0: i32) -> (i32, i32) {
    %c0_i32 = arith.constant 0 : i32
    %c0_i32_0 = arith.constant 0 : i32
    %c0_i32_1 = arith.constant 0 : i32
    return %c0_i32, %c0_i32_0 : i32, i32
  }
  func.func @transform_2(%arg0: i32) -> (i32, i32) {
    %c0_i32 = arith.constant 0 : i32
    %c0_i32_0 = arith.constant 0 : i32
    %c0_i32_1 = arith.constant 0 : i32
    return %c0_i32, %c0_i32_0 : i32, i32
  }
  func.func @transform_3(%arg0: i32) -> (i32, i32, i32) {
    %c0_i32 = arith.constant 0 : i32
    %c0_i32_0 = arith.constant 0 : i32
    %c0_i32_1 = arith.constant 0 : i32
    return %arg0, %c0_i32, %c0_i32_0 : i32, i32, i32
  }
}

module attributes {stable_mosaic.version = 11 : i64} {
  func.func @_classifier_kernel(%arg0: i32, %arg1: memref<1x8x32xf32, #tpu.memory_space<vmem>>, %arg2: memref<32x16xf32, #tpu.memory_space<vmem>>, %arg3: memref<1x16xf32, #tpu.memory_space<vmem>>, %arg4: memref<16x128xf32, #tpu.memory_space<vmem>>, %arg5: memref<1x128xf32, #tpu.memory_space<vmem>>, %arg6: memref<1x1x128xf32, #tpu.memory_space<vmem>>) attributes {dimension_semantics = [#tpu.dimension_semantics<parallel>], iteration_bounds = array<i64: 2>, scalar_prefetch = 0 : i64, scratch_operands = 0 : i64, tpu.core_type = #tpu.core_type<tc>, window_params = [{transform_indices = @transform_0, window_bounds = array<i64: 1, 8, 32>}, {pipeline_mode = #tpu.pipeline_mode<synchronous>, transform_indices = @transform_1, window_bounds = array<i64: 32, 16>}, {pipeline_mode = #tpu.pipeline_mode<synchronous>, transform_indices = @transform_2, window_bounds = array<i64: 1, 16>}, {pipeline_mode = #tpu.pipeline_mode<synchronous>, transform_indices = @transform_3, window_bounds = array<i64: 16, 128>}, {pipeline_mode = #tpu.pipeline_mode<synchronous>, transform_indices = @transform_4, window_bounds = array<i64: 1, 128>}, {transform_indices = @transform_5, window_bounds = array<i64: 1, 1, 128>}]} {
    %c0 = arith.constant 0 : index
    %c0_0 = arith.constant 0 : index
    %c0_1 = arith.constant 0 : index
    %0 = vector.load %arg1[%c0, %c0_0, %c0_1] : memref<1x8x32xf32, #tpu.memory_space<vmem>>, vector<1x8x32xf32>
    %1 = vector.shape_cast %0 : vector<1x8x32xf32> to vector<8x32xf32>
    %2 = vector.extract_strided_slice %1 {offsets = [0, 0], sizes = [1, 32], strides = [1, 1]} : vector<8x32xf32> to vector<1x32xf32>
    %3 = arith.truncf %2 : vector<1x32xf32> to vector<1x32xbf16>
    %c0_2 = arith.constant 0 : index
    %c0_3 = arith.constant 0 : index
    %4 = vector.load %arg2[%c0_2, %c0_3] : memref<32x16xf32, #tpu.memory_space<vmem>>, vector<32x16xf32>
    %5 = arith.truncf %4 : vector<32x16xf32> to vector<32x16xbf16>
    %cst = arith.constant dense<0.000000e+00> : vector<1x16xf32>
    %6 = tpu.matmul %3, %5, %cst {dimension_numbers = #tpu.dot_dimension_numbers<[1], [0], [0], [1], [0, 0, 1, 1], [], []>} : vector<1x32xbf16>, vector<32x16xbf16>, vector<1x16xf32> -> vector<1x16xf32>
    %c0_4 = arith.constant 0 : index
    %c0_5 = arith.constant 0 : index
    %7 = vector.load %arg3[%c0_4, %c0_5] : memref<1x16xf32, #tpu.memory_space<vmem>>, vector<1x16xf32>
    %8 = arith.addf %6, %7 : vector<1x16xf32>
    %cst_6 = arith.constant 0.000000e+00 : f32
    %9 = vector.broadcast %cst_6 : f32 to vector<1x16xf32>
    %10 = arith.maximumf %8, %9 : vector<1x16xf32>
    %11 = arith.truncf %10 : vector<1x16xf32> to vector<1x16xbf16>
    %c0_7 = arith.constant 0 : index
    %c0_8 = arith.constant 0 : index
    %12 = vector.load %arg4[%c0_7, %c0_8] : memref<16x128xf32, #tpu.memory_space<vmem>>, vector<16x128xf32>
    %13 = arith.truncf %12 : vector<16x128xf32> to vector<16x128xbf16>
    %cst_9 = arith.constant dense<0.000000e+00> : vector<1x128xf32>
    %14 = tpu.matmul %11, %13, %cst_9 {dimension_numbers = #tpu.dot_dimension_numbers<[1], [0], [0], [1], [0, 0, 1, 1], [], []>} : vector<1x16xbf16>, vector<16x128xbf16>, vector<1x128xf32> -> vector<1x128xf32>
    %c0_10 = arith.constant 0 : index
    %c0_11 = arith.constant 0 : index
    %15 = vector.load %arg5[%c0_10, %c0_11] : memref<1x128xf32, #tpu.memory_space<vmem>>, vector<1x128xf32>
    %16 = arith.addf %14, %15 : vector<1x128xf32>
    %c0_12 = arith.constant 0 : index
    %c0_13 = arith.constant 0 : index
    %c0_14 = arith.constant 0 : index
    %17 = vector.load %arg6[%c0_12, %c0_13, %c0_14] : memref<1x1x128xf32, #tpu.memory_space<vmem>>, vector<1x1x128xf32>
    %18 = vector.shape_cast %17 : vector<1x1x128xf32> to vector<1x128xf32>
    %19 = vector.shape_cast %16 : vector<1x128xf32> to vector<1x1x128xf32>
    tpu.vector_store %arg6[%c0_12, %c0_13, %c0_14], %19 {strides = array<i32>} : memref<1x1x128xf32, #tpu.memory_space<vmem>>, vector<1x1x128xf32>,
    return
  }
  func.func @transform_0(%arg0: i32) -> (i32, i32, i32) {
    %c0_i32 = arith.constant 0 : i32
    %c0_i32_0 = arith.constant 0 : i32
    %c0_i32_1 = arith.constant 0 : i32
    return %arg0, %c0_i32, %c0_i32_0 : i32, i32, i32
  }
  func.func @transform_1(%arg0: i32) -> (i32, i32) {
    %c0_i32 = arith.constant 0 : i32
    %c0_i32_0 = arith.constant 0 : i32
    %c0_i32_1 = arith.constant 0 : i32
    return %c0_i32, %c0_i32_0 : i32, i32
  }
  func.func @transform_2(%arg0: i32) -> (i32, i32) {
    %c0_i32 = arith.constant 0 : i32
    %c0_i32_0 = arith.constant 0 : i32
    %c0_i32_1 = arith.constant 0 : i32
    return %c0_i32, %c0_i32_0 : i32, i32
  }
  func.func @transform_3(%arg0: i32) -> (i32, i32) {
    %c0_i32 = arith.constant 0 : i32
    %c0_i32_0 = arith.constant 0 : i32
    %c0_i32_1 = arith.constant 0 : i32
    return %c0_i32, %c0_i32_0 : i32, i32
  }
  func.func @transform_4(%arg0: i32) -> (i32, i32) {
    %c0_i32 = arith.constant 0 : i32
    %c0_i32_0 = arith.constant 0 : i32
    %c0_i32_1 = arith.constant 0 : i32
    return %c0_i32, %c0_i32_0 : i32, i32
  }
  func.func @transform_5(%arg0: i32) -> (i32, i32, i32) {
    %c0_i32 = arith.constant 0 : i32
    %c0_i32_0 = arith.constant 0 : i32
    %c0_i32_1 = arith.constant 0 : i32
    return %arg0, %c0_i32, %c0_i32_0 : i32, i32, i32
  }
}

</mosaic_0001>

<bundles_post_ra>
// kernel: anamnesys_forward.4
= control target key start
LH: loop header
LB: loop body
LE: loop exit
PB: predicated region body
PF: predicated region fallthrough
CT: control target
= control target key end

     0   :  { %s301_s12 = smov 0   ;;  %s327_s0 = inlined_call_operand.vmem [shape: f32[2,8,32], index: 0, kind: input, shape index: {}]   ;;  %s328_s1 = inlined_call_operand.vmem [shape: f32[1,32], index: 1, kind: input, shape index: {}]   ;;  %s329_s2 = inlined_call_operand.vmem [shape: f32[1,32], index: 2, kind: input, shape index: {}]   ;;  %s330_s3 = inlined_call_operand.vmem [shape: f32[2,8,32], index: 3, kind: output, shape index: {}]  }
   0x1 LB: > { %s252_s13 = sadd.s32 4294967295, %s279_s12   ;;  %p256_p0 = scmp.ge.s32.totalorder %s279_s12, 1  ;;  %s279_s12 = sphi %s301_s12, %s13_s12  }
   0x2   : > { %p136_p1 = scmp.lt.s32.totalorder %s279_s12, 3 }
   0x4   : > { %p137_p2 = pnand %p256_p0, %p136_p1 }
   0x5   : > { %p158_p3 = scmp.lt.s32.totalorder (!%p137_p2), %s252_s13, 1  ;;  %vm169_vm0 = vcmask (!%p137_p2), 261120   ;;  %v259_v11 = vld [vmem:[%s328_s1] ss:$0 sm:$0xff] (!%p137_p2) }
   0x6   : > { %140 = sbr.rel (%p137_p2) target bundleno = 331 (0x14b), region = 32  ;;  %v260_v13 = vld [vmem:[%s329_s2] ss:$0 sm:$0xff] (!%p137_p2) }
   0xd   : > { %s332_s13 = smov (!%p158_p3, %s252_s13), 1 }
   0xe   : > { %s257_s14 = sshll.u32 %s332_s13, 3 }
   0xf   : > { %s161_s17 = scalar_lea.vmem %s327_s0, %s257_s14  ;;  %s165_s24 = scalar_lea.vmem %s330_s3, %s257_s14 }
  0x10   : > { %v166_v0 = vld [vmem:[%s161_s17] sm:$0xff] }
  0x11   : > { %v170_v1 = vsel %vm169_vm0, %v166_v0, 0.0 }
  0x12   : > { %171 = vadd.xlane.f32.xlu0 %v170_v1 }
  0x9f   : > { %v172_v2 = vpop.xlane.xlu0 %171 }
  0xa0   : > { %v174_v3 = vmul.f32 0.03125, %v172_v2 }
  0xa2   : > { %v175_v4 = vsub.f32 %v166_v0, %v174_v3 }
  0xa4   : > { %v176_v5 = vmul.f32 %v175_v4, %v175_v4 }
  0xa6   : > { %v177_v6 = vsel %vm169_vm0, %v176_v5, 0.0 }
  0xa7   : > { %178 = vadd.xlane.f32.xlu0 %v177_v6 }
 0x134   : > { %v179_v7 = vpop.xlane.xlu0 %178 }
 0x135   : > { %v180_v8 = vmul.f32 0.03125, %v179_v7 }
 0x137   : > { %v181_v9 = vadd.f32 1e-12, %v180_v8 }
 0x139   : > { %271 = vrsqrt.f32 %v181_v9 }
 0x143   : > { %v272_v10 = vpop.eup %271 }
 0x144   : > { %v183_v12 = vmul.f32 %v272_v10, %v175_v4 }
 0x146   : > { %v190_v14 = vmul.f32 %v259_v11, %v183_v12 }
 0x148   : > { %v197_v15 = vadd.f32 %v260_v13, %v190_v14 }
 0x14a   : > { %198 = vst.msk [vmem:[%s165_s24] sm:$0xff] %vm169_vm0, %v197_v15 }
 0x14b PF: > { %s13_s12 = sadd.s32 1, %s279_s12  }
 0x14c   : > { %p10_p4 = scmp.ge.s32.totalorder %s13_s12, 4  }
 0x14e   :  { %12 = sbr.rel (!%p10_p4) target bundleno = 1 (0x1), region = 62 }

// kernel: anamnesys_forward.7
= control target key start
LH: loop header
LB: loop body
LE: loop exit
PB: predicated region body
PF: predicated region fallthrough
CT: control target
= control target key end

     0   :  { %10 = vsyncpa [#allocation3], 0  ;;  %s683_s0 = inlined_call_operand.vmem [shape: f32[2,8,32], index: 0, kind: input, shape index: {}]   ;;  %s684_s1 = inlined_call_operand.vmem [shape: f32[32,16], index: 1, kind: input, shape index: {}]   ;;  %s685_s2 = inlined_call_operand.vmem [shape: f32[1,16], index: 2, kind: input, shape index: {}]   ;;  %s686_s3 = inlined_call_operand.vmem [shape: f32[16,128], index: 3, kind: input, shape index: {}]   ;;  %s687_s4 = inlined_call_operand.vmem [shape: f32[1,128], index: 4, kind: input, shape index: {}]   ;;  %s688_s5 = inlined_call_operand.hbm [shape: f32[2,1,128], index: 5, kind: output, shape index: {}]  }
   0x1   :  { %12 = vsyncpa [#allocation3 + $0x1], 0  ;;  %s559_s18 = smov 0   ;;  %s561_s19 = smov 0  }
   0x2   :  { %s563_s20 = smov 0   ;;  %s565_s21 = smov 0  }
   0x3 LB: > { %s580_s22 = sadd.s32 4294967295, %s524_s21   ;;  %s392_s23 = sadd.s32 4294967294, %s524_s21   ;;  %s524_s21 = sphi %s565_s21, %s694_s21   ;;  %s520_s20 = sphi %s563_s20, %s693_s20   ;;  %s516_s19 = sphi %s561_s19, %s692_s19   ;;  %s512_s18 = sphi %s559_s18, %s691_s18  }
   0x4   : > { %s584_s24 = sadd.s32 1, %s524_s21   ;;  %s135_s25 = sadd.s32 1, %s520_s20 }
   0x5   : > { %s132_s26 = ssub.s32 %s524_s21, %s584_s24  ;;  %p145_p0 = scmp.ne.s32.totalorder %s520_s20, %s516_s19 }
   0x6   : > { %p133_p1 = scmp.eq.s32.totalorder %s132_s26, 0  ;;  %p146_p2 = scmp.eq.s32.totalorder %s580_s22, 1 }
   0x7   : > { %p151_p3 = scmp.ne.s32.totalorder %s516_s19, %s512_s18  ;;  %p152_p4 = scmp.eq.s32.totalorder %s392_s23, 1 }
   0x8   : > { %s595_s27 = scalar_select %p133_p1, %s520_s20, %s135_s25  }
   0x9   : > { %p597_p5 = por %p146_p2, %p145_p0  ;;  %p601_p6 = por %p152_p4, %p151_p3 }
   0xa   : > { %p395_p7 = scmp.ge.s32.totalorder %s524_s21, 1  ;;  %p189_p8 = scmp.lt.s32.totalorder %s524_s21, 3 }
   0xc   : > { %p190_p9 = pnand %p395_p7, %p189_p8 }
   0xd   : > { %v222_v0 = vld [vmem:[%s684_s1] sm:$0xff] (!%p190_p9)  ;;  %v223_v1 = vld [vmem:[%s684_s1 + $0x8] sm:$0xff] (!%p190_p9)  ;;  %v224_v2 = vld [vmem:[%s684_s1 + $0x10] sm:$0xff] (!%p190_p9)  ;;  %p215_p10 = scmp.lt.s32.totalorder (!%p190_p9), %s580_s22, 1  ;;  %v526_v3 = vmov (!%p190_p9), 0.0   ;;  %vm527_vm0 = vmmov (!%p190_p9), 0  }
   0xe   : > { %193 = sbr.rel (%p190_p9) target bundleno = 474 (0x1da), region = 40  ;;  %407 = vmatprep.subr.bf16.mxu0 (!%p190_p9), %v526_v3  ;;  %v226_v4 = vpack.c.bf16 (!%p190_p9), %v223_v1, %v222_v0  ;;  %v225_v5 = vld [vmem:[%s684_s1 + $0x18] sm:$0xff] (!%p190_p9)  ;;  %411 = vmatprep.mubr.msk.bf16.mxu0 (!%p190_p9), %vm527_vm0, %v526_v3  ;;  %vm229_vm1 = vcmask (!%p190_p9), 261120   ;;  %v275_v9 = vld [vmem:[%s686_s3] sm:$0xff] (!%p190_p9)  ;;  %v276_v10 = vld [vmem:[%s686_s3 + $0x8] sm:$0xff] (!%p190_p9)  ;;  %vm279_vm2 = vcmask (!%p190_p9), 130048  }
   0xf   : > { %415 = vmatprep.subr.bf16.mxu1 (!%p190_p9), %v526_v3  ;;  %417 = vmatprep.mubr.msk.bf16.mxu1 (!%p190_p9), %vm527_vm0, %v526_v3  ;;  %v227_v6 = vpack.c.bf16 (!%p190_p9), %v225_v5, %v224_v2  ;;  %v277_v11 = vpack.c.bf16 (!%p190_p9), %v276_v10, %v275_v9  ;;  %v228_v12 = vld [vmem:[%s685_s2] sm:$0x1] (!%p190_p9)  ;;  %s213_s8 = sand.u32 (!%p190_p9), 1, %s516_s19   ;;  %s399_s11 = sshll.u32 (!%p190_p9), %s580_s22, 4 }
  0x10   : > { %408 = vmatpush3.bf16.msra.mxu0 (!%p190_p9), %v226_v4  ;;  %v278_v20 = vld [vmem:[%s687_s4] sm:$0x1] (!%p190_p9)  ;;  %s214_s12 = scalar_lea.vmem (!%p190_p9), [#allocation2], %s213_s8  ;;  %s641_s16 = scalar_lea.hbm (!%p190_p9), %s688_s5, %s399_s11 }
  0x11   : > { %409 = vmatprep.subr.bf16.mxu0 (!%p190_p9), %v526_v3  ;;  %416 = vmatpush3.bf16.msra.mxu1 (!%p190_p9), %v277_v11  ;;  %s528_s23 = smov (!%p190_p9), [#allocation2]  }
  0x12   : > { %s466_s25 = sshll.u32 (!%p190_p9), %s528_s23, 4  ;;  %s467_s25 = int_to_ptr.vmem [resolvable:$false] %s466_s25 }
  0x13   : > { %s468_s26 = scalar_lea.vmem (!%p190_p9), %s467_s25, 32 }
  0x14   : > { %410 = vmatpush3.bf16.msra.mxu0 (!%p190_p9), %v227_v6 }
  0x15   : > { %s216_s13 = scalar_select %p215_p10, %s580_s22, 1 }
  0x17   : > { %s396_s14 = sshll.u32 %s216_s13, 3  ;;  %s337_s13 = sshll.u32 %s214_s12, 4  ;;  %s643_s13 = int_to_ptr.vmem [resolvable:$true] %s337_s13 }
  0x18   : > { %s218_s17 = scalar_lea.vmem %s683_s0, %s396_s14  ;;  %s462_s22 = scalar_lea.vmem %s643_s13, 16 }
  0x19   : > { %v220_v7 = vld [vmem:[%s218_s17] sm:$0xff]  ;;  %s325_s17 = scalar_lea.sflag [#allocation3], %s213_s8  ;;  %p463_p11 = scmp.ne.s32.totalorder %s643_s13, %s462_s22 }
  0x1a   : > { %v221_v8 = vpack.c.bf16 %v220_v7, %v220_v7  ;;  %p469_p0 = scmp.lt.s32.totalorder %s643_s13, %s467_s25  ;;  %p470_p1 = scmp.lt.s32.totalorder %s468_s26, %s462_s22 }
  0x1b   : > { %p464_p12 = pnand %p463_p11, %p597_p5 }
  0x1c   : > { %412 = vmatmul.mubr.msk.bf16.vlgmr.msra.gmra.mrb[0].mxu0 %vm229_vm1, %v221_v8  ;;  %p471_p2 = por %p470_p1, %p469_p0 }
  0x1d   : > { %p465_p13 = pneg %p464_p12 }
  0x1f   : > { %p472_p3 = pnand %p471_p2, %p465_p13 }
  0xef   : > { %v267_v13 = vpop.f32.mrb[0].mxu0 }
  0xf0   : > { %v268_v14 = vadd.f32 %v267_v13, %v228_v12  ;;  %v413_v15 = vpop.f32.mrb[1].mxu0 }
  0xf1   : > { %v270_v16 = vpop.f32.mrb[2].mxu0 }
  0xf2   : > { %v273_v17 = vmax.f32 %v268_v14, 0.0  ;;  %v414_v18 = vpop.f32.mrb[3].mxu0 }
  0xf4   : > { %v274_v19 = vpack.c.bf16 %v273_v17, %v273_v17 }
  0xf6   : > { %418 = vmatmul.mubr.msk.bf16.vlgmr.msra.gmra.mrb[0].mxu1 %vm279_vm2, %v274_v19 }
 0x1c9   : > { %v317_v21 = vpop.f32.mrb[0].mxu1 }
 0x1ca   : > { %v318_v22 = vadd.f32 %v317_v21, %v278_v20  ;;  %v419_v23 = vpop.f32.mrb[1].mxu1 }
 0x1cb   : > { %v320_v24 = vpop.f32.mrb[2].mxu1 }
 0x1cc   : > { %323 = vst [vmem:[%s214_s12] sm:$0x1] %v318_v22  ;;  %v420_v25 = vpop.f32.mrb[3].mxu1 }
 0x1cd   : > { %475 = shalt.err (!%p472_p3)
}
 0x1ce   : > { %s476_s30 = scalar_lea.hbm %s641_s16, 16  ;;  %s480_s8 = scalar_lea.hbm %s688_s5, 32 }
 0x1cf   : > { %p477_p4 = scmp.ne.s32.totalorder %s641_s16, %s476_s30  ;;  %p481_p9 = scmp.lt.u32.totalorder %s641_s16, %s688_s5 }
 0x1d0   : > { %p482_p10 = scmp.lt.u32.totalorder %s480_s8, %s476_s30  ;;  %p484_p12 = scmp.lt.u32.totalorder %s476_s30, %s641_s16 }
 0x1d1   : > { %p478_p7 = pnand %p477_p4, %p597_p5 }
 0x1d2   : > { %p483_p11 = por %p482_p10, %p481_p9 }
 0x1d3   : > { %p479_p8 = pneg %p478_p7 }
 0x1d4   : > { %p485_p13 = por %p484_p12, %p483_p11 }
 0x1d6   : > { %p486_p0 = pnand %p485_p13, %p479_p8 }
 0x1d8   : > { %489 = shalt.err (!%p486_p0)
}
 0x1d9   : > { %421 = dma.vmem_to_hbm [thread:$0]  (%p597_p5), %s643_s13, 16, %s641_s16, %s325_s17  }
 0x1da PF: > { %p427_p1 = scmp.ge.s32.totalorder %s524_s21, 2  ;;  %s349_s11 = sand.u32 1, %s512_s18  }
 0x1db   : > { %s350_s12 = scalar_lea.sflag [#allocation3], %s349_s11 }
 0x1dc   : > { %p424_p2 = pnand %p427_p1, %p601_p6 }
 0x1de   : > { %507 = dma.done.wait (!%p424_p2), %s350_s12, 16  }
 0x1df   : > { %509 = vsyncadd (!%p424_p2), %s350_s12, 4294967280  ;;  %p15_p3 = scmp.ge.s32.totalorder %s584_s24, 4   ;;  %s691_s18 = smov %s516_s19 }
 0x1e0   : > { %s692_s19 = smov %s520_s20  ;;  %s693_s20 = smov %s595_s27 }
 0x1e1   : > { %s694_s21 = smov %s584_s24  ;;  %17 = sbr.rel (!%p15_p3) target bundleno = 3 (0x3), region = 75 }
 0x1e8   :  { %354 = vsyncpa [#allocation3], 1 }
 0x1e9   :  { %356 = vsyncpa [#allocation3 + $0x1], 1 }

// kernel: anamnesys_forward.5
= control target key start
LH: loop header
LB: loop body
LE: loop exit
PB: predicated region body
PF: predicated region fallthrough
CT: control target
= control target key end

     0   :  { %s1398_s18 = smov 0   ;;  %s1572_s0 = inlined_call_operand.vmem [shape: f32[2,8,32], index: 0, kind: input, shape index: {}]   ;;  %s1573_s1 = inlined_call_operand.vmem [shape: f32[2,1,8], index: 1, kind: input, shape index: {}]   ;;  %s1574_s2 = inlined_call_operand.vmem [shape: f32[2,8,8], index: 2, kind: input, shape index: {}]   ;;  %s1575_s3 = inlined_call_operand.vmem [shape: f32[32,96], index: 3, kind: input, shape index: {}]   ;;  %s1576_s4 = inlined_call_operand.vmem [shape: f32[1,96], index: 4, kind: input, shape index: {}]   ;;  %s1577_s5 = inlined_call_operand.vmem [shape: f32[32,32], index: 5, kind: input, shape index: {}]   ;;  %s1578_s6 = inlined_call_operand.vmem [shape: f32[1,32], index: 6, kind: input, shape index: {}]   ;;  %s1579_s7 = inlined_call_operand.vmem [shape: f32[1,32], index: 7, kind: input, shape index: {}]   ;;  %s1580_s8 = inlined_call_operand.vmem [shape: f32[1,32], index: 8, kind: input, shape index: {}]   ;;  %s1581_s9 = inlined_call_operand.vmem [shape: f32[32,64], index: 9, kind: input, shape index: {}]   ;;  %s1582_s10 = inlined_call_operand.vmem [shape: f32[1,64], index: 10, kind: input, shape index: {}]   ;;  %s1583_s11 = inlined_call_operand.vmem [shape: f32[64,32], index: 11, kind: input, shape index: {}]   ;;  %s1584_s12 = inlined_call_operand.vmem [shape: f32[1,32], index: 12, kind: input, shape index: {}]   ;;  %s1585_s13 = inlined_call_operand.vmem [shape: f32[1,32], index: 13, kind: input, shape index: {}]   ;;  %s1586_s14 = inlined_call_operand.vmem [shape: f32[1,32], index: 14, kind: input, shape index: {}]   ;;  %s1587_s15 = inlined_call_operand.vmem [shape: f32[2,8,32], index: 15, kind: output, shape index: {}]  }
   0x1 LB: > { %s1159_s19 = sadd.s32 4294967295, %s1309_s18   ;;  %p1163_p0 = scmp.ge.s32.totalorder %s1309_s18, 1  ;;  %s1309_s18 = sphi %s1398_s18, %s25_s18  }
   0x2   : > { %p444_p1 = scmp.lt.s32.totalorder %s1309_s18, 3 }
   0x4   : > { %p445_p2 = pnand %p1163_p0, %p444_p1 }
   0x5   : > { %v508_v0 = vld [vmem:[%s1575_s3] sm:$0xff] (!%p445_p2)  ;;  %v509_v1 = vld [vmem:[%s1575_s3 + $0x8] sm:$0xff] (!%p445_p2)  ;;  %v510_v2 = vld [vmem:[%s1575_s3 + $0x10] sm:$0xff] (!%p445_p2)  ;;  %p493_p3 = scmp.lt.s32.totalorder (!%p445_p2), %s1159_s19, 1  ;;  %v1311_v3 = vmov (!%p445_p2), 0.0   ;;  %vm1312_vm0 = vmmov (!%p445_p2), 0  }
   0x6   : > { %448 = sbr.rel (%p445_p2) target bundleno = 2418 (0x972), region = 80  ;;  %1210 = vmatprep.subr.bf16.mxu1 (!%p445_p2), %v1311_v3  ;;  %v512_v4 = vpack.c.bf16 (!%p445_p2), %v509_v1, %v508_v0  ;;  %v511_v5 = vld [vmem:[%s1575_s3 + $0x18] sm:$0xff] (!%p445_p2)  ;;  %1214 = vmatprep.mubr.msk.bf16.mxu1 (!%p445_p2), %vm1312_vm0, %v1311_v3  ;;  %vm521_vm1 = vcmask (!%p445_p2), 261120   ;;  %v1166_v9 = vld [vmem:[%s1576_s4] ss:$0 sm:$0xff] (!%p445_p2)  ;;  %s1313_s21 = smov (!%p445_p2), 112  }
   0x7   : > { %1224 = vmatprep.subr.bf16.mxu0 (!%p445_p2), %v1311_v3  ;;  %1226 = vmatprep.mubr.msk.bf16.mxu0 (!%p445_p2), %vm1312_vm0, %v1311_v3  ;;  %v513_v6 = vpack.c.bf16 (!%p445_p2), %v511_v5, %v510_v2  ;;  %s1314_s22 = smov (!%p445_p2), 96   ;;  %s1315_s23 = smov (!%p445_p2), 80   ;;  %vm569_vm2 = vcmask (!%p445_p2), 130048   ;;  %v617_v22 = vld [vmem:[%s1574_s2] sm:$0xff] (!%p445_p2)  ;;  %vm626_vm3 = vcmask (!%p445_p2), 64512   ;;  %v1172_v32 = vld [vmem:[%s1574_s2 + $0x8] sm:$0xff] (!%p445_p2) }
   0x8   : > { %1211 = vmatpush3.bf16.msra.mxu1 (!%p445_p2), %v512_v4  ;;  %s1316_s17 = smov (!%p445_p2), 64   ;;  %s1317_s20 = smov (!%p445_p2), 48   ;;  %vm644_vm4 = vcmask (!%p445_p2), 1043456   ;;  %v689_v62 = vld [vmem:[%s1577_s5] sm:$0xff] (!%p445_p2)  ;;  %v690_v63 = vld [vmem:[%s1577_s5 + $0x8] sm:$0xff] (!%p445_p2)  ;;  %v808_v1 = vld [vmem:[%s1577_s5 + $0x10] sm:$0xff] (!%p445_p2) }
   0x9   : > { %1212 = vmatprep.subr.bf16.mxu1 (!%p445_p2), %v1311_v3  ;;  %v691_v0 = vpack.c.bf16 (!%p445_p2), %v690_v63, %v689_v62  ;;  %v809_v2 = vld [vmem:[%s1577_s5 + $0x18] sm:$0xff] (!%p445_p2)  ;;  %vm1022_vm5 = vcmask (!%p445_p2), 523264  }
   0xa   : > { %v810_v4 = vpack.c.bf16 (!%p445_p2), %v809_v2, %v808_v1 }
   0xc   : > { %1213 = vmatpush3.bf16.msra.mxu1 (!%p445_p2), %v513_v6 }
   0xd   : > { %s1589_s19 = smov (!%p493_p3, %s1159_s19), 1  ;;  %1218 = vmatprep.subr.bf16.mxu1 %v1311_v3 }
   0xe   : > { %s1164_s28 = sshll.u32 %s1589_s19, 3  ;;  %s499_s26 = scalar_lea.vmem %s1573_s1, %s1589_s19 }
   0xf   : > { %s496_s16 = scalar_lea.vmem %s1572_s0, %s1164_s28  ;;  %v1169_v26 = vld [vmem:[%s499_s26] ss:$0 sm:$0xff] }
  0x10   : > { %v1433_v7 = vld [vmem:[%s496_s16] sm:$0xff] }
  0x11   : > { %v507_v8 = vpack.c.bf16 %v1433_v7, %v1433_v7 }
  0x13   : > { %1215 = vmatmul.mubr.msk.bf16.vlgmr.msra.gmra.mrb[0].mxu1 %vm521_vm1, %v507_v8 }
  0x14   : > { %1220 = vmatprep.mubr.msk.bf16.mxu1 %vm1312_vm0, %v1311_v3 }
  0xe6   : > { %v559_v10 = vpop.f32.mrb[0].mxu1 }
  0xe7   : > { %v560_v11 = vadd.f32 %v1166_v9, %v559_v10  ;;  %v1216_v12 = vpop.f32.mrb[1].mxu1 }
  0xe8   : > { %v562_v13 = vpop.f32.mrb[2].mxu1 }
  0xe9   : > { %v565_v14 = vpack.c.bf16 %v560_v11, %v560_v11  ;;  %v1217_v15 = vpop.f32.mrb[3].mxu1 }
  0xeb   : > { %692 = vrot.lane.b32.xlu1 %v565_v14, %s1313_s21  ;;  %567 = vrot.lane.b32.xlu0 %v565_v14, %s1314_s22  ;;  %s503_s21 = scalar_lea.vmem %s1587_s15, %s1164_s28 }
  0xef   : > { %694 = vrot.lane.b32.xlu0 %v565_v14, %s1315_s23 }
 0x15d   : > { %v568_v16 = vpop.permute.xlu0 %567  ;;  %v693_v20 = vpop.permute.xlu1 %692 }
 0x15e   : > { %v574_v17 = vsel %vm569_vm2, %v568_v16, 0 }
 0x15f   : > { %1219 = vmatpush3.bf16.xpose.msra.mxu1 %v574_v17 }
 0x160   : > { %1230 = vmatprep.subr.bf16.mxu1 %v1311_v3 }
 0x161   : > { %v695_v18 = vpop.permute.xlu0 %694 }
 0x162   : > { %v700_v19 = vsel %vm569_vm2, %v695_v18, 0 }
 0x166   : > { %1221 = vmatmul.mubr.msk.bf16.vlgmr.msra.gmra.mrb[4].mxu1 %vm569_vm2, %v565_v14 }
 0x167   : > { %1231 = vmatpush3.bf16.xpose.msra.mxu1 %v700_v19  ;;  %1232 = vmatprep.mubr.msk.bf16.mxu1 %vm1312_vm0, %v1311_v3 }
 0x168   : > { %1242 = vmatprep.subr.bf16.mxu1 %v1311_v3 }
 0x16e   : > { %1233 = vmatmul.mubr.msk.bf16.vlgmr.msra.gmra.mrb[8].mxu1 %vm569_vm2, %v693_v20 }
 0x16f   : > { %1244 = vmatprep.mubr.msk.bf16.mxu1 %vm1312_vm0, %v1311_v3  ;;  %1243 = vmatpush3.bf16.msra.mxu1 %v810_v4 }
 0x170   : > { %1254 = vmatprep.subr.bf16.mxu1 %v1311_v3 }
 0x239   : > { %v610_v21 = vpop.f32.mrb[4].mxu1 }
 0x23a   : > { %v616_v23 = vmul.f32 0.25, %v610_v21  ;;  %v1222_v24 = vpop.f32.mrb[5].mxu1  ;;  %v1176_v21 = vld [vmem:[%s1578_s6] ss:$0 sm:$0xff] }
 0x23b   : > { %v613_v25 = vpop.f32.mrb[6].mxu1 }
 0x23c   : > { %v618_v27 = vadd.f32 %v617_v22, %v616_v23  ;;  %v1223_v28 = vpop.f32.mrb[7].mxu1 }
 0x23e   : > { %v625_v29 = vadd.f32 %v1169_v26, %v618_v27 }
 0x240   : > { %v627_v30 = vsel %vm626_vm3, %v625_v29, -inf }
 0x241   : > { %628 = vmax.xlane.f32.xlu1 %v627_v30  ;;  %v736_v31 = vpop.f32.mrb[8].mxu1 }
 0x242   : > { %v742_v33 = vmul.f32 0.25, %v736_v31  ;;  %v1234_v34 = vpop.f32.mrb[9].mxu1 }
 0x243   : > { %v739_v35 = vpop.f32.mrb[10].mxu1  ;;  %v937_v34 = vld [vmem:[%s1581_s9] sm:$0xff] }
 0x244   : > { %v745_v36 = vadd.f32 %v1172_v32, %v742_v33  ;;  %v1235_v37 = vpop.f32.mrb[11].mxu1  ;;  %v938_v35 = vld [vmem:[%s1581_s9 + $0x8] sm:$0xff] }
 0x245   : > { %v940_v37 = vld [vmem:[%s1581_s9 + $0x18] sm:$0xff] }
 0x246   : > { %v746_v38 = vadd.f32 %v1169_v26, %v745_v36  ;;  %v941_v36 = vpack.c.bf16 %v938_v35, %v937_v34 }
 0x248   : > { %v747_v39 = vsel %vm626_vm3, %v746_v38, -inf }
 0x249   : > { %748 = vmax.xlane.f32.xlu0 %v747_v39 }
 0x2ce   : > { %v629_v40 = vpop.xlane.xlu1 %628 }
 0x2cf   : > { %v630_v41 = vsub.f32 %v625_v29, %v629_v40 }
 0x2d1   : > { %v631_v42 = vmul.f32 1.442695, %v630_v41 }
 0x2d3   : > { %1289 = vpow2.f32 %v631_v42 }
 0x2d6   : > { %v749_v43 = vpop.xlane.xlu0 %748 }
 0x2d7   : > { %v750_v44 = vsub.f32 %v746_v38, %v749_v43  ;;  %v1177_v43 = vld [vmem:[%s1579_s7] ss:$0 sm:$0xff] }
 0x2d9   : > { %v751_v45 = vmul.f32 1.442695, %v750_v44 }
 0x2db   : > { %1291 = vpow2.f32 %v751_v45  ;;  %v1178_v45 = vld [vmem:[%s1580_s8] ss:$0 sm:$0xff] }
 0x2dd   : > { %v1290_v46 = vpop.eup %1289 }
 0x2de   : > { %v633_v47 = vsel %vm626_vm3, %v1290_v46, 0.0 }
 0x2df   : > { %634 = vadd.xlane.f32.xlu0 %v633_v47 }
 0x2e5   : > { %v1292_v48 = vpop.eup %1291 }
 0x2e6   : > { %v753_v49 = vsel %vm626_vm3, %v1292_v48, 0.0 }
 0x2e7   : > { %754 = vadd.xlane.f32.xlu1 %v753_v49  ;;  %v1003_v49 = vld [vmem:[%s1583_s11] sm:$0xff] }
 0x2f5   : > { %639 = vrot.lane.b32.xlu0 %v565_v14, %s1316_s17 }
 0x2f8   : > { %759 = vrot.lane.b32.xlu1 %v565_v14, %s1317_s20 }
 0x36c   : > { %v635_v50 = vpop.xlane.xlu0 %634 }
 0x36d   : > { %1293 = vrcp.f32 %v635_v50  ;;  %v1004_v50 = vld [vmem:[%s1583_s11 + $0x8] sm:$0xff] }
 0x370   : > { %v640_v51 = vpop.permute.xlu0 %639 }
 0x371   : > { %v646_v52 = vsel %vm644_vm4, %v640_v51, 0  ;;  %v1005_v51 = vld [vmem:[%s1583_s11 + $0x10] sm:$0xff] }
 0x372   : > { %1225 = vmatpush3.bf16.msra.mxu0 %v646_v52  ;;  %v1011_v52 = vpack.c.bf16 %v1004_v50, %v1003_v49 }
 0x373   : > { %1236 = vmatprep.subr.bf16.mxu0 %v1311_v3 }
 0x374   : > { %v755_v53 = vpop.xlane.xlu1 %754 }
 0x375   : > { %1295 = vrcp.f32 %v755_v53  ;;  %v1006_v53 = vld [vmem:[%s1583_s11 + $0x18] sm:$0xff] }
 0x377   : > { %v1294_v54 = vpop.eup %1293 }
 0x378   : > { %v637_v55 = vmul.f32 %v1294_v54, %v1290_v46  ;;  %v760_v56 = vpop.permute.xlu1 %759  ;;  %v1012_v54 = vpack.c.bf16 %v1006_v53, %v1005_v51 }
 0x379   : > { %v765_v58 = vsel %vm644_vm4, %v760_v56, 0  ;;  %v1008_v56 = vld [vmem:[%s1583_s11 + $0x28] sm:$0xff] }
 0x37a   : > { %v638_v57 = vpack.c.bf16 %v637_v55, %v637_v55  ;;  %v1007_v55 = vld [vmem:[%s1583_s11 + $0x20] sm:$0xff] }
 0x37c   : > { %1227 = vmatmul.mubr.msk.bf16.vlgmr.msra.gmra.mrb[0].mxu0 %vm626_vm3, %v638_v57  ;;  %v1013_v57 = vpack.c.bf16 %v1008_v56, %v1007_v55 }
 0x37d   : > { %1237 = vmatpush3.bf16.msra.mxu0 %v765_v58  ;;  %1238 = vmatprep.mubr.msk.bf16.mxu0 %vm1312_vm0, %v1311_v3  ;;  %v1009_v58 = vld [vmem:[%s1583_s11 + $0x30] sm:$0xff] }
 0x37e   : > { %1248 = vmatprep.subr.bf16.mxu0 %v1311_v3 }
 0x37f   : > { %v1296_v59 = vpop.eup %1295 }
 0x380   : > { %v757_v60 = vmul.f32 %v1296_v59, %v1292_v48  ;;  %v1010_v59 = vld [vmem:[%s1583_s11 + $0x38] sm:$0xff] }
 0x382   : > { %v758_v61 = vpack.c.bf16 %v757_v60, %v757_v60  ;;  %v1014_v60 = vpack.c.bf16 %v1010_v59, %v1009_v58 }
 0x384   : > { %1239 = vmatmul.mubr.msk.bf16.vlgmr.msra.gmra.mrb[4].mxu0 %vm626_vm3, %v758_v61  ;;  %v1179_v61 = vld [vmem:[%s1582_s10] ss:$0 sm:$0xff] }
 0x385   : > { %1250 = vmatprep.mubr.msk.bf16.mxu0 %vm1312_vm0, %v1311_v3  ;;  %1249 = vmatpush3.bf16.msra.mxu0 %v691_v0 }
 0x386   : > { %1262 = vmatprep.subr.bf16.mxu0 %v1311_v3 }
 0x44f   : > { %v682_v5 = vpop.f32.mrb[0].mxu0 }
 0x450   : > { %v688_v6 = vpack.c.bf16 %v682_v5, %v682_v5  ;;  %v1228_v8 = vpop.f32.mrb[1].mxu0 }
 0x451   : > { %v685_v9 = vpop.f32.mrb[2].mxu0 }
 0x452   : > { %v1229_v10 = vpop.f32.mrb[3].mxu0  ;;  %1251 = vmatmul.mubr.msk.bf16.vlgmr.msra.gmra.mrb[8].mxu0 %vm569_vm2, %v688_v6 }
 0x453   : > { %1270 = vmatprep.mubr.msk.bf16.mxu0 %vm1312_vm0, %v1311_v3  ;;  %1263 = vmatpush3.bf16.msra.mxu0 %v1011_v52 }
 0x454   : > { %1264 = vmatprep.subr.bf16.mxu0 %v1311_v3 }
 0x457   : > { %v801_v11 = vpop.f32.mrb[4].mxu0  ;;  %1265 = vmatpush3.bf16.msra.mxu0 %v1012_v54 }
 0x458   : > { %v807_v12 = vpack.c.bf16 %v801_v11, %v801_v11  ;;  %v1240_v13 = vpop.f32.mrb[5].mxu0  ;;  %1266 = vmatprep.subr.bf16.mxu0 %v1311_v3 }
 0x459   : > { %v804_v14 = vpop.f32.mrb[6].mxu0 }
 0x45a   : > { %v1241_v15 = vpop.f32.mrb[7].mxu0  ;;  %1245 = vmatmul.mubr.msk.bf16.vlgmr.msra.gmra.mrb[12].mxu1 %vm569_vm2, %v807_v12  ;;  %v1181_v14 = vld [vmem:[%s1584_s12] ss:$0 sm:$0xff] }
 0x45b   : > { %1258 = vmatprep.mubr.msk.bf16.mxu1 %vm1312_vm0, %v1311_v3  ;;  %1255 = vmatpush3.bf16.msra.mxu1 %v941_v36 }
 0x45c   : > { %1256 = vmatprep.subr.bf16.mxu1 %v1311_v3  ;;  %1267 = vmatpush3.bf16.msra.mxu0 %v1013_v57 }
 0x45d   : > { %1268 = vmatprep.subr.bf16.mxu0 %v1311_v3 }
 0x460   : > { %1269 = vmatpush3.bf16.msra.mxu0 %v1014_v60 }
 0x525   : > { %v891_v16 = vpop.f32.mrb[8].mxu0 }
 0x526   : > { %v1252_v17 = vpop.f32.mrb[9].mxu0 }
 0x527   : > { %v894_v18 = vpop.f32.mrb[10].mxu0 }
 0x528   : > { %v1253_v19 = vpop.f32.mrb[11].mxu0 }
 0x52d   : > { %v848_v20 = vpop.f32.mrb[12].mxu1 }
 0x52e   : > { %v892_v22 = vadd.f32 %v891_v16, %v848_v20  ;;  %v1246_v23 = vpop.f32.mrb[13].mxu1 }
 0x52f   : > { %v851_v24 = vpop.f32.mrb[14].mxu1 }
 0x530   : > { %v904_v25 = vadd.f32 %v1176_v21, %v892_v22  ;;  %v1247_v26 = vpop.f32.mrb[15].mxu1 }
 0x532   : > { %v905_v27 = vadd.f32 %v904_v25, %v1433_v7  ;;  %v939_v7 = vld [vmem:[%s1581_s9 + $0x10] sm:$0xff] }
 0x533   : > { %v942_v38 = vpack.c.bf16 %v940_v37, %v939_v7 }
 0x534   : > { %v908_v28 = vsel %vm521_vm1, %v905_v27, 0.0 }
 0x535   : > { %909 = vadd.xlane.f32.xlu1 %v908_v28  ;;  %1257 = vmatpush3.bf16.msra.mxu1 %v942_v38 }
 0x5c2   : > { %v910_v29 = vpop.xlane.xlu1 %909 }
 0x5c3   : > { %v912_v30 = vmul.f32 0.03125, %v910_v29 }
 0x5c5   : > { %v913_v31 = vsub.f32 %v905_v27, %v912_v30 }
 0x5c7   : > { %v914_v32 = vmul.f32 %v913_v31, %v913_v31 }
 0x5c9   : > { %v915_v33 = vsel %vm521_vm1, %v914_v32, 0.0 }
 0x5ca   : > { %916 = vadd.xlane.f32.xlu0 %v915_v33  ;;  %v1184_v33 = vld [vmem:[%s1586_s14] ss:$0 sm:$0xff] }
 0x657   : > { %v917_v39 = vpop.xlane.xlu0 %916 }
 0x658   : > { %v918_v40 = vmul.f32 0.03125, %v917_v39 }
 0x65a   : > { %v919_v41 = vadd.f32 1e-12, %v918_v40 }
 0x65c   : > { %1297 = vrsqrt.f32 %v919_v41 }
 0x666   : > { %v1298_v42 = vpop.eup %1297 }
 0x667   : > { %v921_v44 = vmul.f32 %v1298_v42, %v913_v31  ;;  %v1183_v31 = vld [vmem:[%s1585_s13] ss:$0 sm:$0xff] }
 0x669   : > { %v928_v46 = vmul.f32 %v1177_v43, %v921_v44 }
 0x66b   : > { %v935_v47 = vadd.f32 %v1178_v45, %v928_v46 }
 0x66d   : > { %v936_v48 = vpack.c.bf16 %v935_v47, %v935_v47 }
 0x66f   : > { %1259 = vmatmul.mubr.msk.bf16.vlgmr.msra.gmra.mrb[16].mxu1 %vm521_vm1, %v936_v48 }
 0x742   : > { %v987_v62 = vpop.f32.mrb[16].mxu1 }
 0x743   : > { %v988_v63 = vadd.f32 %v1179_v61, %v987_v62  ;;  %v1260_v0 = vpop.f32.mrb[17].mxu1 }
 0x744   : > { %v990_v1 = vpop.f32.mrb[18].mxu1 }
 0x745   : > { %v994_v2 = vmul.f32 0.044715, %v988_v63  ;;  %v1261_v4 = vpop.f32.mrb[19].mxu1  ;;  %v993_v11 = vmul.f32 0.5, %v988_v63 }
 0x747   : > { %v995_v5 = vmul.f32 %v994_v2, %v988_v63 }
 0x749   : > { %v996_v6 = vmul.f32 %v995_v5, %v988_v63 }
 0x74b   : > { %v997_v8 = vadd.f32 %v996_v6, %v988_v63 }
 0x74d   : > { %v998_v9 = vmul.f32 0.7978846, %v997_v8 }
 0x74f   : > { %1299 = vtanh.f32 %v998_v9 }
 0x759   : > { %v1300_v10 = vpop.eup %1299 }
 0x75a   : > { %v1000_v12 = vadd.f32 1.0, %v1300_v10 }
 0x75c   : > { %v1001_v3 = vmul.f32 %v1000_v12, %v993_v11 }
 0x75e   : > { %v1002_v13 = vpack.c.bf16 %v1001_v3, %v1001_v3 }
 0x760   : > { %1271 = vmatmul.mubr.msk.bf16.vlgmr.msra.gmra.mrb[12].mxu0 %vm1022_vm5, %v1002_v13 }
 0x833   : > { %v1060_v15 = vpop.f32.mrb[12].mxu0 }
 0x834   : > { %v1061_v16 = vadd.f32 %v1181_v14, %v1060_v15  ;;  %v1272_v17 = vpop.f32.mrb[13].mxu0 }
 0x835   : > { %v1063_v18 = vpop.f32.mrb[14].mxu0 }
 0x836   : > { %v1273_v19 = vpop.f32.mrb[15].mxu0  ;;  %v1066_v20 = vadd.f32 %v1061_v16, %v935_v47 }
 0x838   : > { %v1069_v21 = vsel %vm521_vm1, %v1066_v20, 0.0 }
 0x839   : > { %1070 = vadd.xlane.f32.xlu0 %v1069_v21 }
 0x8c6   : > { %v1071_v22 = vpop.xlane.xlu0 %1070 }
 0x8c7   : > { %v1072_v23 = vmul.f32 0.03125, %v1071_v22 }
 0x8c9   : > { %v1073_v24 = vsub.f32 %v1066_v20, %v1072_v23 }
 0x8cb   : > { %v1074_v25 = vmul.f32 %v1073_v24, %v1073_v24 }
 0x8cd   : > { %v1075_v26 = vsel %vm521_vm1, %v1074_v25, 0.0 }
 0x8ce   : > { %1076 = vadd.xlane.f32.xlu1 %v1075_v26 }
 0x95b   : > { %v1077_v27 = vpop.xlane.xlu1 %1076 }
 0x95c   : > { %v1078_v28 = vmul.f32 0.03125, %v1077_v27 }
 0x95e   : > { %v1079_v29 = vadd.f32 1e-12, %v1078_v28 }
 0x960   : > { %1301 = vrsqrt.f32 %v1079_v29 }
 0x96a   : > { %v1302_v30 = vpop.eup %1301 }
 0x96b   : > { %v1081_v32 = vmul.f32 %v1302_v30, %v1073_v24 }
 0x96d   : > { %v1088_v34 = vmul.f32 %v1183_v31, %v1081_v32 }
 0x96f   : > { %v1095_v35 = vadd.f32 %v1184_v33, %v1088_v34 }
 0x971   : > { %1096 = vst.msk [vmem:[%s503_s21] sm:$0xff] %vm521_vm1, %v1095_v35 }
 0x972 PF: > { %s25_s18 = sadd.s32 1, %s1309_s18  }
 0x973   : > { %p22_p4 = scmp.ge.s32.totalorder %s25_s18, 4  }
 0x975   :  { %24 = sbr.rel (!%p22_p4) target bundleno = 1 (0x1), region = 114 }

</bundles_post_ra>
